<compile_context>
chip_gen: v5e
topology: v5e:2x2
jax: 0.10.0
libtpu: 0.0.40
codegen_flags: <defaults>
</compile_context>

<pallas_src>
import math
import jax
import jax.numpy as jnp
from jax.experimental import pallas as pl
from jax.experimental.pallas import tpu as pltpu

# ---------------- model dimensions (small, synthetic) ----------------
B, S, H = 2, 8, 32          # batch, seq, hidden (in_features = H)
NH, HD = 2, 16              # heads, head dim
FFN = 64                    # feed-forward dim
VOCAB = 100
NUM_CLASSES = 2
LN_EPS = 1e-12
BS = B * S


def bert_cls_kernel(idcol_ref, idrow_ref, bidcol_ref, bidrow_ref,
                    tokemb_ref, posemb_ref,
                    wqkv_ref, bqkv_ref, wo_ref, bo_ref,
                    ln1g_ref, ln1b_ref,
                    w1_ref, b1_ref, w2_ref, b2_ref,
                    ln2g_ref, ln2b_ref,
                    wp_ref, bp_ref, wc_ref, bc_ref,
                    out_ref):
    # ---- in-kernel embedding lookup: one-hot(ids) @ tok_emb on the MXU ----
    ids_col = idcol_ref[...]                                        # (BS, 1) int32
    vocab_iota = jax.lax.broadcasted_iota(jnp.int32, (BS, VOCAB), 1)
    onehot = (ids_col == vocab_iota).astype(jnp.bfloat16)           # (BS, VOCAB)
    x = jnp.dot(onehot, tokemb_ref[...],
                preferred_element_type=jnp.float32)                 # (BS, H) f32
    x = x + posemb_ref[...]                                         # pre-tiled (BS, H)

    # ---- block-diagonal additive attention bias -----------------------------
    # allowed(i, j) = same batch AND key j not padding (attention_mask = ids>0)
    ids_row = idrow_ref[...]                                        # (1, BS) int32
    allowed = (bidcol_ref[...] == bidrow_ref[...]) & (ids_row > 0)  # (BS, BS) bool
    bias = jnp.where(allowed, 0.0, -1e9).astype(jnp.float32)        # (BS, BS) f32

    # ---- fused QKV projection: one (BS, H) x (H, 3H) matmul ----
    qkv = jnp.dot(x.astype(jnp.bfloat16), wqkv_ref[...],
                  preferred_element_type=jnp.float32) + bqkv_ref[...]   # (BS, 3H)
    q = qkv[:, 0:H]
    k = qkv[:, H:2 * H]
    v = qkv[:, 2 * H:3 * H]

    scale = 1.0 / math.sqrt(HD)
    dn = (((1,), (1,)), ((), ()))          # contract head dim of q and k; no kh.T
    ctx_heads = []
    for h in range(NH):                    # static unrolled, NH = 2
        cols = slice(h * HD, (h + 1) * HD)
        qh = q[:, cols].astype(jnp.bfloat16)
        kh = k[:, cols].astype(jnp.bfloat16)
        vh = v[:, cols].astype(jnp.bfloat16)
        scores = jax.lax.dot_general(
            qh, kh, dn, preferred_element_type=jnp.float32)         # (BS, BS)
        scores = scores * scale + bias
        scores = scores - jnp.max(scores, axis=-1, keepdims=True)
        p = jnp.exp(scores)
        denom = jnp.sum(p, axis=-1, keepdims=True)                  # (BS, 1)
        ctx = jnp.dot(p.astype(jnp.bfloat16), vh,
                      preferred_element_type=jnp.float32)           # (BS, HD)
        # normalize the small (BS, HD) ctx, not the (BS, BS) probs; EUP recip
        ctx_heads.append(ctx * pl.reciprocal(denom, approx=True))
    ctx = jnp.concatenate(ctx_heads, axis=1)                        # (BS, H)

    # single output projection for all heads / all batch elements
    attn_out = jnp.dot(ctx.astype(jnp.bfloat16), wo_ref[...],
                       preferred_element_type=jnp.float32) + bo_ref[...]

    def layer_norm(y, g, beta):
        mu = jnp.mean(y, axis=-1, keepdims=True)
        var = jnp.mean((y - mu) ** 2, axis=-1, keepdims=True)
        return (y - mu) * jax.lax.rsqrt(var + LN_EPS) * g + beta

    h1 = layer_norm(x + attn_out, ln1g_ref[...], ln1b_ref[...])

    # ---- feed-forward ----
    ff = jnp.dot(h1.astype(jnp.bfloat16), w1_ref[...],
                 preferred_element_type=jnp.float32) + b1_ref[...]
    # TODO(synk): HF BERT default is exact erf GELU; tanh approximation used here.
    ff = jax.nn.gelu(ff, approximate=True)
    ff = jnp.dot(ff.astype(jnp.bfloat16), w2_ref[...],
                 preferred_element_type=jnp.float32) + b2_ref[...]

    h2 = layer_norm(h1 + ff, ln2g_ref[...], ln2b_ref[...])

    # ---- BERT pooler on each sequence's [CLS] row, then classifier head ----
    cls_tok = jnp.concatenate([h2[b * S:b * S + 1, :] for b in range(B)],
                              axis=0)                               # (B, H)
    pooled = jnp.tanh(jnp.dot(cls_tok.astype(jnp.bfloat16), wp_ref[...],
                              preferred_element_type=jnp.float32) + bp_ref[...])
    logits = jnp.dot(pooled.astype(jnp.bfloat16), wc_ref[...],
                     preferred_element_type=jnp.float32) + bc_ref[...]  # (B, 2)
    out_ref[...] = logits


def mymodel_forward(batch_seqs, params):
    """batch_seqs: int32 [B, S] token ids. Returns float32 [B, 2] logits."""
    ids = batch_seqs.astype(jnp.int32)
    ids_col = ids.reshape(BS, 1)        # column layout for in-kernel one-hot
    ids_row = ids.reshape(1, BS)        # row layout for key-padding mask
    # batch-id vectors for the block-diagonal mask (constants under jit)
    bid = jnp.repeat(jnp.arange(B, dtype=jnp.int32), S)
    bid_col = bid.reshape(BS, 1)
    bid_row = bid.reshape(1, BS)

    inputs = [
        ids_col, ids_row, bid_col, bid_row,
        params["tok_emb"], params["pos_emb"],
        params["wqkv"], params["bqkv"],
        params["wo"], params["bo"],
        params["ln1g"], params["ln1b"],
        params["w1"], params["b1"],
        params["w2"], params["b2"],
        params["ln2g"], params["ln2b"],
        params["wp"], params["bp"],
        params["wc"], params["bc"],
    ]
    vmem = pl.BlockSpec(memory_space=pltpu.MemorySpace.VMEM)

    out = pl.pallas_call(
        bert_cls_kernel,
        out_shape=jax.ShapeDtypeStruct((B, NUM_CLASSES), jnp.float32),
        in_specs=[vmem] * len(inputs),   # gridless: whole arrays resident in VMEM
        out_specs=vmem,
    )(*inputs)
    return out                           # (B, 2)


def init_params(key):
    ks = jax.random.split(key, 12)
    std = 0.02

    def w(k, shape):
        return (std * jax.random.normal(k, shape)).astype(jnp.float32)

    wq, wk, wv = w(ks[2], (H, H)), w(ks[3], (H, H)), w(ks[4], (H, H))

    params = {
        # embeddings (token table in bf16: only feeds the MXU one-hot matmul)
        "tok_emb": w(ks[0], (VOCAB, H)).astype(jnp.bfloat16),
        # position embeddings pre-tiled to (B*S, H): no in-kernel concat
        "pos_emb": jnp.tile(w(ks[1], (S, H)), (B, 1)),
        # fused attention projections (in, 3*out) in bf16
        "wqkv": jnp.concatenate([wq, wk, wv], axis=1).astype(jnp.bfloat16),
        "bqkv": jnp.zeros((1, 3 * H), jnp.float32),
        "wo": w(ks[5], (H, H)).astype(jnp.bfloat16),
        "bo": jnp.zeros((1, H), jnp.float32),
        "ln1g": jnp.ones((1, H), jnp.float32),
        "ln1b": jnp.zeros((1, H), jnp.float32),
        # feed-forward
        "w1": w(ks[6], (H, FFN)).astype(jnp.bfloat16),
        "b1": jnp.zeros((1, FFN), jnp.float32),
        "w2": w(ks[7], (FFN, H)).astype(jnp.bfloat16),
        "b2": jnp.zeros((1, H), jnp.float32),
        "ln2g": jnp.ones((1, H), jnp.float32),
        "ln2b": jnp.zeros((1, H), jnp.float32),
        # pooler
        "wp": w(ks[8], (H, H)).astype(jnp.bfloat16),
        "bp": jnp.zeros((1, H), jnp.float32),
        # classification head: nn.Linear(in_features=H, out_features=2)
        "wc": w(ks[9], (H, NUM_CLASSES)).astype(jnp.bfloat16),
        "bc": jnp.zeros((1, NUM_CLASSES), jnp.float32),
    }
    return params


if __name__ == "__main__":
    key = jax.random.PRNGKey(0)
    pkey, dkey = jax.random.split(key)
    params = init_params(pkey)

    # deterministic token ids in [1, VOCAB); zero out the tail as padding so
    # the attention_mask (= batch_seqs > 0) is non-trivial.
    seqs = jax.random.randint(dkey, (B, S), 1, VOCAB, dtype=jnp.int32)
    pad = jnp.arange(S)[None, :] >= (S - 2)
    batch_seqs = jnp.where(pad, 0, seqs)

    forward = jax.jit(mymodel_forward)
    logits = forward(batch_seqs, params)
    jax.block_until_ready(logits)
    assert logits.shape == (B, NUM_CLASSES) and logits.dtype == jnp.float32
    assert bool(jnp.all(jnp.isfinite(logits)))
    print("KERNEL_OK")
</pallas_src>

<mosaic_0001>
module attributes {stable_mosaic.version = 11 : i64} {
  func.func @bert_cls_kernel(%arg0: memref<16x1xi32, #tpu.memory_space<vmem>>, %arg1: memref<1x16xi32, #tpu.memory_space<vmem>>, %arg2: memref<16x1xi32, #tpu.memory_space<vmem>>, %arg3: memref<1x16xi32, #tpu.memory_space<vmem>>, %arg4: memref<100x32xbf16, #tpu.memory_space<vmem>>, %arg5: memref<16x32xf32, #tpu.memory_space<vmem>>, %arg6: memref<32x96xbf16, #tpu.memory_space<vmem>>, %arg7: memref<1x96xf32, #tpu.memory_space<vmem>>, %arg8: memref<32x32xbf16, #tpu.memory_space<vmem>>, %arg9: memref<1x32xf32, #tpu.memory_space<vmem>>, %arg10: memref<1x32xf32, #tpu.memory_space<vmem>>, %arg11: memref<1x32xf32, #tpu.memory_space<vmem>>, %arg12: memref<32x64xbf16, #tpu.memory_space<vmem>>, %arg13: memref<1x64xf32, #tpu.memory_space<vmem>>, %arg14: memref<64x32xbf16, #tpu.memory_space<vmem>>, %arg15: memref<1x32xf32, #tpu.memory_space<vmem>>, %arg16: memref<1x32xf32, #tpu.memory_space<vmem>>, %arg17: memref<1x32xf32, #tpu.memory_space<vmem>>, %arg18: memref<32x32xbf16, #tpu.memory_space<vmem>>, %arg19: memref<1x32xf32, #tpu.memory_space<vmem>>, %arg20: memref<32x2xbf16, #tpu.memory_space<vmem>>, %arg21: memref<1x2xf32, #tpu.memory_space<vmem>>, %arg22: memref<2x2xf32, #tpu.memory_space<vmem>>) attributes {dimension_semantics = [], scalar_prefetch = 0 : i64, scratch_operands = 0 : i64, tpu.core_type = #tpu.core_type<tc>} {
    %c0 = arith.constant 0 : index
    %c0_0 = arith.constant 0 : index
    %0 = vector.load %arg0[%c0, %c0_0] : memref<16x1xi32, #tpu.memory_space<vmem>>, vector<16x1xi32>
    %1 = tpu.iota {dimensions = array<i32: 1>} : vector<16x100xi32>
    %2 = vector.broadcast %0 : vector<16x1xi32> to vector<16x100xi32>
    %3 = arith.cmpi eq, %2, %1 : vector<16x100xi32>
    %4 = arith.extui %3 : vector<16x100xi1> to vector<16x100xi32>
    %5 = arith.sitofp %4 : vector<16x100xi32> to vector<16x100xf32>
    %6 = arith.truncf %5 : vector<16x100xf32> to vector<16x100xbf16>
    %c0_1 = arith.constant 0 : index
    %c0_2 = arith.constant 0 : index
    %7 = vector.load %arg4[%c0_1, %c0_2] : memref<100x32xbf16, #tpu.memory_space<vmem>>, vector<100x32xbf16>
    %cst = arith.constant dense<0.000000e+00> : vector<16x32xf32>
    %8 = tpu.matmul %6, %7, %cst {dimension_numbers = #tpu.dot_dimension_numbers<[1], [0], [0], [1], [0, 0, 1, 1], [], []>} : vector<16x100xbf16>, vector<100x32xbf16>, vector<16x32xf32> -> vector<16x32xf32>
    %c0_3 = arith.constant 0 : index
    %c0_4 = arith.constant 0 : index
    %9 = vector.load %arg5[%c0_3, %c0_4] : memref<16x32xf32, #tpu.memory_space<vmem>>, vector<16x32xf32>
    %10 = arith.addf %8, %9 : vector<16x32xf32>
    %c0_5 = arith.constant 0 : index
    %c0_6 = arith.constant 0 : index
    %11 = vector.load %arg1[%c0_5, %c0_6] : memref<1x16xi32, #tpu.memory_space<vmem>>, vector<1x16xi32>
    %c0_7 = arith.constant 0 : index
    %c0_8 = arith.constant 0 : index
    %12 = vector.load %arg2[%c0_7, %c0_8] : memref<16x1xi32, #tpu.memory_space<vmem>>, vector<16x1xi32>
    %c0_9 = arith.constant 0 : index
    %c0_10 = arith.constant 0 : index
    %13 = vector.load %arg3[%c0_9, %c0_10] : memref<1x16xi32, #tpu.memory_space<vmem>>, vector<1x16xi32>
    %14 = vector.broadcast %12 : vector<16x1xi32> to vector<16x16xi32>
    %15 = vector.broadcast %13 : vector<1x16xi32> to vector<16x16xi32>
    %16 = arith.cmpi eq, %14, %15 : vector<16x16xi32>
    %c0_i32 = arith.constant 0 : i32
    %17 = vector.broadcast %c0_i32 : i32 to vector<1x16xi32>
    %18 = arith.cmpi sgt, %11, %17 : vector<1x16xi32>
    %19 = vector.broadcast %18 : vector<1x16xi1> to vector<16x16xi1>
    %20 = arith.andi %16, %19 : vector<16x16xi1>
    %cst_11 = arith.constant 0.000000e+00 : f32
    %cst_12 = arith.constant -1.000000e+09 : f32
    %21 = vector.broadcast %cst_11 : f32 to vector<16x16xf32>
    %22 = vector.broadcast %cst_12 : f32 to vector<16x16xf32>
    %23 = arith.select %20, %21, %22 : vector<16x16xi1>, vector<16x16xf32>
    %24 = arith.truncf %10 : vector<16x32xf32> to vector<16x32xbf16>
    %c0_13 = arith.constant 0 : index
    %c0_14 = arith.constant 0 : index
    %25 = vector.load %arg6[%c0_13, %c0_14] : memref<32x96xbf16, #tpu.memory_space<vmem>>, vector<32x96xbf16>
    %cst_15 = arith.constant dense<0.000000e+00> : vector<16x96xf32>
    %26 = tpu.matmul %24, %25, %cst_15 {dimension_numbers = #tpu.dot_dimension_numbers<[1], [0], [0], [1], [0, 0, 1, 1], [], []>} : vector<16x32xbf16>, vector<32x96xbf16>, vector<16x96xf32> -> vector<16x96xf32>
    %c0_16 = arith.constant 0 : index
    %c0_17 = arith.constant 0 : index
    %27 = vector.load %arg7[%c0_16, %c0_17] : memref<1x96xf32, #tpu.memory_space<vmem>>, vector<1x96xf32>
    %28 = vector.broadcast %27 : vector<1x96xf32> to vector<16x96xf32>
    %29 = arith.addf %26, %28 : vector<16x96xf32>
    %30 = vector.extract_strided_slice %29 {offsets = [0, 0], sizes = [16, 32], strides = [1, 1]} : vector<16x96xf32> to vector<16x32xf32>
    %31 = vector.extract_strided_slice %29 {offsets = [0, 32], sizes = [16, 32], strides = [1, 1]} : vector<16x96xf32> to vector<16x32xf32>
    %32 = vector.extract_strided_slice %29 {offsets = [0, 64], sizes = [16, 32], strides = [1, 1]} : vector<16x96xf32> to vector<16x32xf32>
    %33 = vector.extract_strided_slice %30 {offsets = [0, 0], sizes = [16, 16], strides = [1, 1]} : vector<16x32xf32> to vector<16x16xf32>
    %34 = arith.truncf %33 : vector<16x16xf32> to vector<16x16xbf16>
    %35 = vector.extract_strided_slice %31 {offsets = [0, 0], sizes = [16, 16], strides = [1, 1]} : vector<16x32xf32> to vector<16x16xf32>
    %36 = arith.truncf %35 : vector<16x16xf32> to vector<16x16xbf16>
    %37 = vector.extract_strided_slice %32 {offsets = [0, 0], sizes = [16, 16], strides = [1, 1]} : vector<16x32xf32> to vector<16x16xf32>
    %38 = arith.truncf %37 : vector<16x16xf32> to vector<16x16xbf16>
    %cst_18 = arith.constant dense<0.000000e+00> : vector<16x16xf32>
    %39 = tpu.matmul %34, %36, %cst_18 {dimension_numbers = #tpu.dot_dimension_numbers<[1], [1], [0], [0], [0, 0, 1, 0], [], []>} : vector<16x16xbf16>, vector<16x16xbf16>, vector<16x16xf32> -> vector<16x16xf32>
    %cst_19 = arith.constant 2.500000e-01 : f32
    %40 = vector.broadcast %cst_19 : f32 to vector<16x16xf32>
    %41 = arith.mulf %39, %40 : vector<16x16xf32>
    %42 = arith.addf %41, %23 : vector<16x16xf32>
    %cst_20 = arith.constant dense<0xFF800000> : vector<16xf32>
    %43 = vector.multi_reduction <maximumf>, %42, %cst_20 [1] : vector<16x16xf32> to vector<16xf32>
    %44 = vector.shape_cast %43 : vector<16xf32> to vector<16x1xf32>
    %45 = vector.broadcast %44 : vector<16x1xf32> to vector<16x16xf32>
    %46 = arith.subf %42, %45 : vector<16x16xf32>
    %47 = math.exp %46 : vector<16x16xf32>
    %cst_21 = arith.constant dense<0.000000e+00> : vector<16xf32>
    %48 = vector.multi_reduction <add>, %47, %cst_21 [1] : vector<16x16xf32> to vector<16xf32>
    %49 = vector.shape_cast %48 : vector<16xf32> to vector<16x1xf32>
    %50 = arith.truncf %47 : vector<16x16xf32> to vector<16x16xbf16>
    %cst_22 = arith.constant dense<0.000000e+00> : vector<16x16xf32>
    %51 = tpu.matmul %50, %38, %cst_22 {dimension_numbers = #tpu.dot_dimension_numbers<[1], [0], [0], [1], [0, 0, 1, 1], [], []>} : vector<16x16xbf16>, vector<16x16xbf16>, vector<16x16xf32> -> vector<16x16xf32>
    %52 = tpu.reciprocal %49 {approx = true} : vector<16x1xf32> -> vector<16x1xf32>
    %53 = vector.broadcast %52 : vector<16x1xf32> to vector<16x16xf32>
    %54 = arith.mulf %51, %53 : vector<16x16xf32>
    %55 = vector.extract_strided_slice %30 {offsets = [0, 16], sizes = [16, 16], strides = [1, 1]} : vector<16x32xf32> to vector<16x16xf32>
    %56 = arith.truncf %55 : vector<16x16xf32> to vector<16x16xbf16>
    %57 = vector.extract_strided_slice %31 {offsets = [0, 16], sizes = [16, 16], strides = [1, 1]} : vector<16x32xf32> to vector<16x16xf32>
    %58 = arith.truncf %57 : vector<16x16xf32> to vector<16x16xbf16>
    %59 = vector.extract_strided_slice %32 {offsets = [0, 16], sizes = [16, 16], strides = [1, 1]} : vector<16x32xf32> to vector<16x16xf32>
    %60 = arith.truncf %59 : vector<16x16xf32> to vector<16x16xbf16>
    %cst_23 = arith.constant dense<0.000000e+00> : vector<16x16xf32>
    %61 = tpu.matmul %56, %58, %cst_23 {dimension_numbers = #tpu.dot_dimension_numbers<[1], [1], [0], [0], [0, 0, 1, 0], [], []>} : vector<16x16xbf16>, vector<16x16xbf16>, vector<16x16xf32> -> vector<16x16xf32>
    %cst_24 = arith.constant 2.500000e-01 : f32
    %62 = vector.broadcast %cst_24 : f32 to vector<16x16xf32>
    %63 = arith.mulf %61, %62 : vector<16x16xf32>
    %64 = arith.addf %63, %23 : vector<16x16xf32>
    %cst_25 = arith.constant dense<0xFF800000> : vector<16xf32>
    %65 = vector.multi_reduction <maximumf>, %64, %cst_25 [1] : vector<16x16xf32> to vector<16xf32>
    %66 = vector.shape_cast %65 : vector<16xf32> to vector<16x1xf32>
    %67 = vector.broadcast %66 : vector<16x1xf32> to vector<16x16xf32>
    %68 = arith.subf %64, %67 : vector<16x16xf32>
    %69 = math.exp %68 : vector<16x16xf32>
    %cst_26 = arith.constant dense<0.000000e+00> : vector<16xf32>
    %70 = vector.multi_reduction <add>, %69, %cst_26 [1] : vector<16x16xf32> to vector<16xf32>
    %71 = vector.shape_cast %70 : vector<16xf32> to vector<16x1xf32>
    %72 = arith.truncf %69 : vector<16x16xf32> to vector<16x16xbf16>
    %cst_27 = arith.constant dense<0.000000e+00> : vector<16x16xf32>
    %73 = tpu.matmul %72, %60, %cst_27 {dimension_numbers = #tpu.dot_dimension_numbers<[1], [0], [0], [1], [0, 0, 1, 1], [], []>} : vector<16x16xbf16>, vector<16x16xbf16>, vector<16x16xf32> -> vector<16x16xf32>
    %74 = tpu.reciprocal %71 {approx = true} : vector<16x1xf32> -> vector<16x1xf32>
    %75 = vector.broadcast %74 : vector<16x1xf32> to vector<16x16xf32>
    %76 = arith.mulf %73, %75 : vector<16x16xf32>
    %77 = tpu.concatenate %54, %76 in 1 : vector<16x16xf32>, vector<16x16xf32> -> vector<16x32xf32>
    %78 = arith.truncf %77 : vector<16x32xf32> to vector<16x32xbf16>
    %c0_28 = arith.constant 0 : index
    %c0_29 = arith.constant 0 : index
    %79 = vector.load %arg8[%c0_28, %c0_29] : memref<32x32xbf16, #tpu.memory_space<vmem>>, vector<32x32xbf16>
    %cst_30 = arith.constant dense<0.000000e+00> : vector<16x32xf32>
    %80 = tpu.matmul %78, %79, %cst_30 {dimension_numbers = #tpu.dot_dimension_numbers<[1], [0], [0], [1], [0, 0, 1, 1], [], []>} : vector<16x32xbf16>, vector<32x32xbf16>, vector<16x32xf32> -> vector<16x32xf32>
    %c0_31 = arith.constant 0 : index
    %c0_32 = arith.constant 0 : index
    %81 = vector.load %arg9[%c0_31, %c0_32] : memref<1x32xf32, #tpu.memory_space<vmem>>, vector<1x32xf32>
    %82 = vector.broadcast %81 : vector<1x32xf32> to vector<16x32xf32>
    %83 = arith.addf %80, %82 : vector<16x32xf32>
    %84 = arith.addf %10, %83 : vector<16x32xf32>
    %c0_33 = arith.constant 0 : index
    %c0_34 = arith.constant 0 : index
    %85 = vector.load %arg10[%c0_33, %c0_34] : memref<1x32xf32, #tpu.memory_space<vmem>>, vector<1x32xf32>
    %c0_35 = arith.constant 0 : index
    %c0_36 = arith.constant 0 : index
    %86 = vector.load %arg11[%c0_35, %c0_36] : memref<1x32xf32, #tpu.memory_space<vmem>>, vector<1x32xf32>
    %cst_37 = arith.constant dense<0.000000e+00> : vector<16xf32>
    %87 = vector.multi_reduction <add>, %84, %cst_37 [1] : vector<16x32xf32> to vector<16xf32>
    %88 = vector.shape_cast %87 : vector<16xf32> to vector<16x1xf32>
    %cst_38 = arith.constant 3.200000e+01 : f32
    %89 = vector.broadcast %cst_38 : f32 to vector<16x1xf32>
    %90 = arith.divf %88, %89 : vector<16x1xf32>
    %91 = vector.broadcast %90 : vector<16x1xf32> to vector<16x32xf32>
    %92 = arith.subf %84, %91 : vector<16x32xf32>
    %93 = arith.mulf %92, %92 : vector<16x32xf32>
    %cst_39 = arith.constant dense<0.000000e+00> : vector<16xf32>
    %94 = vector.multi_reduction <add>, %93, %cst_39 [1] : vector<16x32xf32> to vector<16xf32>
    %95 = vector.shape_cast %94 : vector<16xf32> to vector<16x1xf32>
    %cst_40 = arith.constant 3.200000e+01 : f32
    %96 = vector.broadcast %cst_40 : f32 to vector<16x1xf32>
    %97 = arith.divf %95, %96 : vector<16x1xf32>
    %98 = vector.broadcast %90 : vector<16x1xf32> to vector<16x32xf32>
    %99 = arith.subf %84, %98 : vector<16x32xf32>
    %cst_41 = arith.constant 9.99999996E-13 : f32
    %100 = vector.broadcast %cst_41 : f32 to vector<16x1xf32>
    %101 = arith.addf %97, %100 : vector<16x1xf32>
    %102 = math.rsqrt %101 : vector<16x1xf32>
    %103 = vector.broadcast %102 : vector<16x1xf32> to vector<16x32xf32>
    %104 = arith.mulf %99, %103 : vector<16x32xf32>
    %105 = vector.broadcast %85 : vector<1x32xf32> to vector<16x32xf32>
    %106 = arith.mulf %104, %105 : vector<16x32xf32>
    %107 = vector.broadcast %86 : vector<1x32xf32> to vector<16x32xf32>
    %108 = arith.addf %106, %107 : vector<16x32xf32>
    %109 = arith.truncf %108 : vector<16x32xf32> to vector<16x32xbf16>
    %c0_42 = arith.constant 0 : index
    %c0_43 = arith.constant 0 : index
    %110 = vector.load %arg12[%c0_42, %c0_43] : memref<32x64xbf16, #tpu.memory_space<vmem>>, vector<32x64xbf16>
    %cst_44 = arith.constant dense<0.000000e+00> : vector<16x64xf32>
    %111 = tpu.matmul %109, %110, %cst_44 {dimension_numbers = #tpu.dot_dimension_numbers<[1], [0], [0], [1], [0, 0, 1, 1], [], []>} : vector<16x32xbf16>, vector<32x64xbf16>, vector<16x64xf32> -> vector<16x64xf32>
    %c0_45 = arith.constant 0 : index
    %c0_46 = arith.constant 0 : index
    %112 = vector.load %arg13[%c0_45, %c0_46] : memref<1x64xf32, #tpu.memory_space<vmem>>, vector<1x64xf32>
    %113 = vector.broadcast %112 : vector<1x64xf32> to vector<16x64xf32>
    %114 = arith.addf %111, %113 : vector<16x64xf32>
    %115 = arith.mulf %114, %114 : vector<16x64xf32>
    %116 = arith.mulf %114, %115 : vector<16x64xf32>
    %cst_47 = arith.constant 4.471500e-02 : f32
    %117 = vector.broadcast %cst_47 : f32 to vector<16x64xf32>
    %118 = arith.mulf %117, %116 : vector<16x64xf32>
    %119 = arith.addf %114, %118 : vector<16x64xf32>
    %cst_48 = arith.constant 0.797884583 : f32
    %120 = vector.broadcast %cst_48 : f32 to vector<16x64xf32>
    %121 = arith.mulf %120, %119 : vector<16x64xf32>
    %122 = math.tanh %121 : vector<16x64xf32>
    %cst_49 = arith.constant 1.000000e+00 : f32
    %123 = vector.broadcast %cst_49 : f32 to vector<16x64xf32>
    %124 = arith.addf %123, %122 : vector<16x64xf32>
    %cst_50 = arith.constant 5.000000e-01 : f32
    %125 = vector.broadcast %cst_50 : f32 to vector<16x64xf32>
    %126 = arith.mulf %125, %124 : vector<16x64xf32>
    %127 = arith.mulf %114, %126 : vector<16x64xf32>
    %128 = arith.truncf %127 : vector<16x64xf32> to vector<16x64xbf16>
    %c0_51 = arith.constant 0 : index
    %c0_52 = arith.constant 0 : index
    %129 = vector.load %arg14[%c0_51, %c0_52] : memref<64x32xbf16, #tpu.memory_space<vmem>>, vector<64x32xbf16>
    %cst_53 = arith.constant dense<0.000000e+00> : vector<16x32xf32>
    %130 = tpu.matmul %128, %129, %cst_53 {dimension_numbers = #tpu.dot_dimension_numbers<[1], [0], [0], [1], [0, 0, 1, 1], [], []>} : vector<16x64xbf16>, vector<64x32xbf16>, vector<16x32xf32> -> vector<16x32xf32>
    %c0_54 = arith.constant 0 : index
    %c0_55 = arith.constant 0 : index
    %131 = vector.load %arg15[%c0_54, %c0_55] : memref<1x32xf32, #tpu.memory_space<vmem>>, vector<1x32xf32>
    %132 = vector.broadcast %131 : vector<1x32xf32> to vector<16x32xf32>
    %133 = arith.addf %130, %132 : vector<16x32xf32>
    %134 = arith.addf %108, %133 : vector<16x32xf32>
    %c0_56 = arith.constant 0 : index
    %c0_57 = arith.constant 0 : index
    %135 = vector.load %arg16[%c0_56, %c0_57] : memref<1x32xf32, #tpu.memory_space<vmem>>, vector<1x32xf32>
    %c0_58 = arith.constant 0 : index
    %c0_59 = arith.constant 0 : index
    %136 = vector.load %arg17[%c0_58, %c0_59] : memref<1x32xf32, #tpu.memory_space<vmem>>, vector<1x32xf32>
    %cst_60 = arith.constant dense<0.000000e+00> : vector<16xf32>
    %137 = vector.multi_reduction <add>, %134, %cst_60 [1] : vector<16x32xf32> to vector<16xf32>
    %138 = vector.shape_cast %137 : vector<16xf32> to vector<16x1xf32>
    %cst_61 = arith.constant 3.200000e+01 : f32
    %139 = vector.broadcast %cst_61 : f32 to vector<16x1xf32>
    %140 = arith.divf %138, %139 : vector<16x1xf32>
    %141 = vector.broadcast %140 : vector<16x1xf32> to vector<16x32xf32>
    %142 = arith.subf %134, %141 : vector<16x32xf32>
    %143 = arith.mulf %142, %142 : vector<16x32xf32>
    %cst_62 = arith.constant dense<0.000000e+00> : vector<16xf32>
    %144 = vector.multi_reduction <add>, %143, %cst_62 [1] : vector<16x32xf32> to vector<16xf32>
    %145 = vector.shape_cast %144 : vector<16xf32> to vector<16x1xf32>
    %cst_63 = arith.constant 3.200000e+01 : f32
    %146 = vector.broadcast %cst_63 : f32 to vector<16x1xf32>
    %147 = arith.divf %145, %146 : vector<16x1xf32>
    %148 = vector.broadcast %140 : vector<16x1xf32> to vector<16x32xf32>
    %149 = arith.subf %134, %148 : vector<16x32xf32>
    %cst_64 = arith.constant 9.99999996E-13 : f32
    %150 = vector.broadcast %cst_64 : f32 to vector<16x1xf32>
    %151 = arith.addf %147, %150 : vector<16x1xf32>
    %152 = math.rsqrt %151 : vector<16x1xf32>
    %153 = vector.broadcast %152 : vector<16x1xf32> to vector<16x32xf32>
    %154 = arith.mulf %149, %153 : vector<16x32xf32>
    %155 = vector.broadcast %135 : vector<1x32xf32> to vector<16x32xf32>
    %156 = arith.mulf %154, %155 : vector<16x32xf32>
    %157 = vector.broadcast %136 : vector<1x32xf32> to vector<16x32xf32>
    %158 = arith.addf %156, %157 : vector<16x32xf32>
    %159 = vector.extract_strided_slice %158 {offsets = [0, 0], sizes = [1, 32], strides = [1, 1]} : vector<16x32xf32> to vector<1x32xf32>
    %160 = vector.extract_strided_slice %158 {offsets = [8, 0], sizes = [1, 32], strides = [1, 1]} : vector<16x32xf32> to vector<1x32xf32>
    %161 = tpu.concatenate %159, %160 in 0 : vector<1x32xf32>, vector<1x32xf32> -> vector<2x32xf32>
    %162 = arith.truncf %161 : vector<2x32xf32> to vector<2x32xbf16>
    %c0_65 = arith.constant 0 : index
    %c0_66 = arith.constant 0 : index
    %163 = vector.load %arg18[%c0_65, %c0_66] : memref<32x32xbf16, #tpu.memory_space<vmem>>, vector<32x32xbf16>
    %cst_67 = arith.constant dense<0.000000e+00> : vector<2x32xf32>
    %164 = tpu.matmul %162, %163, %cst_67 {dimension_numbers = #tpu.dot_dimension_numbers<[1], [0], [0], [1], [0, 0, 1, 1], [], []>} : vector<2x32xbf16>, vector<32x32xbf16>, vector<2x32xf32> -> vector<2x32xf32>
    %c0_68 = arith.constant 0 : index
    %c0_69 = arith.constant 0 : index
    %165 = vector.load %arg19[%c0_68, %c0_69] : memref<1x32xf32, #tpu.memory_space<vmem>>, vector<1x32xf32>
    %166 = vector.broadcast %165 : vector<1x32xf32> to vector<2x32xf32>
    %167 = arith.addf %164, %166 : vector<2x32xf32>
    %168 = math.tanh %167 : vector<2x32xf32>
    %169 = arith.truncf %168 : vector<2x32xf32> to vector<2x32xbf16>
    %c0_70 = arith.constant 0 : index
    %c0_71 = arith.constant 0 : index
    %170 = vector.load %arg20[%c0_70, %c0_71] : memref<32x2xbf16, #tpu.memory_space<vmem>>, vector<32x2xbf16>
    %cst_72 = arith.constant dense<0.000000e+00> : vector<2x2xf32>
    %171 = tpu.matmul %169, %170, %cst_72 {dimension_numbers = #tpu.dot_dimension_numbers<[1], [0], [0], [1], [0, 0, 1, 1], [], []>} : vector<2x32xbf16>, vector<32x2xbf16>, vector<2x2xf32> -> vector<2x2xf32>
    %c0_73 = arith.constant 0 : index
    %c0_74 = arith.constant 0 : index
    %172 = vector.load %arg21[%c0_73, %c0_74] : memref<1x2xf32, #tpu.memory_space<vmem>>, vector<1x2xf32>
    %173 = vector.broadcast %172 : vector<1x2xf32> to vector<2x2xf32>
    %174 = arith.addf %171, %173 : vector<2x2xf32>
    %c0_75 = arith.constant 0 : index
    %c0_76 = arith.constant 0 : index
    %175 = vector.load %arg22[%c0_75, %c0_76] : memref<2x2xf32, #tpu.memory_space<vmem>>, vector<2x2xf32>
    tpu.vector_store %arg22[%c0_75, %c0_76], %174 {strides = array<i32>} : memref<2x2xf32, #tpu.memory_space<vmem>>, vector<2x2xf32>,
    return
  }
}

</mosaic_0001>

<bundles_post_ra>
// kernel: mymodel_forward.1
= control target key start
LH: loop header
LB: loop body
LE: loop exit
PB: predicated region body
PF: predicated region fallthrough
CT: control target
= control target key end

     0   :  { %s1255_s0 = inlined_call_operand.vmem [shape: s32[16,1], index: 0, kind: input, shape index: {}]   ;;  %s1256_s1 = inlined_call_operand.vmem [shape: s32[1,16], index: 1, kind: input, shape index: {}]   ;;  %s1257_s2 = inlined_call_operand.vmem [shape: s32[16,1], index: 2, kind: input, shape index: {}]   ;;  %s1258_s3 = inlined_call_operand.vmem [shape: s32[1,16], index: 3, kind: input, shape index: {}]   ;;  %s1259_s4 = inlined_call_operand.vmem [shape: bf16[100,32], index: 4, kind: input, shape index: {}]   ;;  %s1260_s5 = inlined_call_operand.vmem [shape: f32[16,32], index: 5, kind: input, shape index: {}]   ;;  %s1261_s6 = inlined_call_operand.vmem [shape: bf16[32,96], index: 6, kind: input, shape index: {}]   ;;  %s1262_s7 = inlined_call_operand.vmem [shape: f32[1,96], index: 7, kind: input, shape index: {}]   ;;  %s1263_s8 = inlined_call_operand.vmem [shape: bf16[32,32], index: 8, kind: input, shape index: {}]   ;;  %s1264_s9 = inlined_call_operand.vmem [shape: f32[1,32], index: 9, kind: input, shape index: {}]   ;;  %s1265_s10 = inlined_call_operand.vmem [shape: f32[1,32], index: 10, kind: input, shape index: {}]   ;;  %s1266_s11 = inlined_call_operand.vmem [shape: f32[1,32], index: 11, kind: input, shape index: {}]   ;;  %s1267_s12 = inlined_call_operand.vmem [shape: bf16[32,64], index: 12, kind: input, shape index: {}]   ;;  %s1268_s13 = inlined_call_operand.vmem [shape: f32[1,64], index: 13, kind: input, shape index: {}]   ;;  %s1269_s14 = inlined_call_operand.vmem [shape: bf16[64,32], index: 14, kind: input, shape index: {}]   ;;  %s1270_s15 = inlined_call_operand.vmem [shape: f32[1,32], index: 15, kind: input, shape index: {}]   ;;  %s1271_s16 = inlined_call_operand.vmem [shape: f32[1,32], index: 16, kind: input, shape index: {}]   ;;  %s1272_s17 = inlined_call_operand.vmem [shape: f32[1,32], index: 17, kind: input, shape index: {}]   ;;  %s1273_s18 = inlined_call_operand.vmem [shape: bf16[32,32], index: 18, kind: input, shape index: {}]   ;;  %s1274_s19 = inlined_call_operand.vmem [shape: f32[1,32], index: 19, kind: input, shape index: {}]   ;;  %s1275_s20 = inlined_call_operand.vmem [shape: bf16[32,2], index: 20, kind: input, shape index: {}]   ;;  %s1276_s21 = inlined_call_operand.vmem [shape: f32[1,2], index: 21, kind: input, shape index: {}]   ;;  %s1277_s22 = inlined_call_operand.hbm [shape: f32[2,2], index: 22, kind: output, shape index: {}]  }
   0x1   :  { %1283 = sst [smem:[#allocation5_spill]] %s1255_s0 }
   0x2   :  { %1284 = sst [smem:[#allocation6_spill]] %s1256_s1 }
   0x3   :  { %1285 = sst [smem:[#allocation7_spill]] %s1257_s2 }
   0x4   :  { %1286 = sst [smem:[#allocation8_spill]] %s1258_s3 }
   0x5   :  { %1287 = sst [smem:[#allocation9_spill]] %s1259_s4 }
   0x6   :  { %1288 = sst [smem:[#allocation10_spill]] %s1260_s5 }
   0x7   :  { %1289 = sst [smem:[#allocation11_spill]] %s1261_s6 }
   0x8   :  { %1290 = sst [smem:[#allocation12_spill]] %s1272_s17 }
   0x9   :  { %s1291_s29 = sld [smem:[#allocation5_spill]]  ;;  %v950_v2 = vmov 0   ;;  %vm148_vm0 = vcmask 1041408  }
   0xa   :  { %s1292_s17 = sld [smem:[#allocation9_spill]]  ;;  %873 = vset.pattern.permute.xlu0 %v950_v2  ;;  %874 = vset.pattern.permute.xlu1 %v950_v2 }
   0xb   :  { %875 = vset.pattern.permute.xlu2 %v950_v2 }
   0xf   :  { %v73_v0 = vld [vmem:[%s1291_s29] sm:$0xff] }
  0x10   :  { %v102_v1 = vld [vmem:[%s1292_s17 + $0x30] sm:$0x3]  ;;  %78 = vperm.xlu0 %873, %v73_v0   ;;  %v847_v6 = vld [vmem:[%s1292_s17 + $0x28] sm:$0xff] }
  0x11   :  { %v130_v3 = vunpack.c.l.b16 %v102_v1 }
  0x13   :  { %v137_v4 = vpack.c.b16 %v130_v3, %v130_v3 }
  0x15   :  { %v150_v5 = vsel %vm148_vm0, %v137_v4, 0 }
  0x16   :  { %153 = vmatpush.bf16.msra.mxu0 %v150_v5 }
  0x17   :  { %27 = vsyncpa [#allocation3], 0  ;;  %v74_v7 = vld [vmem:[%s1291_s29 + $0x8] sm:$0xff]  ;;  %v846_v8 = vld [vmem:[%s1292_s17 + $0x20] sm:$0xff]  ;;  %v75_v13 = vlaneseq  ;;  %v951_v17 = vmov 0.0   ;;  %vm144_vm3 = vcmask 818176  }
  0x18   :  { %81 = vperm.xlu0 %873, %v74_v7   ;;  %v845_v9 = vld [vmem:[%s1292_s17 + $0x18] sm:$0xff]  ;;  %v844_v10 = vld [vmem:[%s1292_s17 + $0x10] sm:$0xff]  ;;  %v843_v11 = vld [vmem:[%s1292_s17 + $0x8] sm:$0xff]  ;;  %s1293_s23 = sld [smem:[#allocation11_spill]]  ;;  %vm208_vm4 = vcmask 261120   ;;  %s952_s3 = smov 96  }
  0x19   :  { %v842_v12 = vld [vmem:[%s1292_s17] sm:$0xff]  ;;  %v76_v15 = vand.u32 127, %v75_v13  ;;  %s1294_s6 = sld [smem:[#allocation10_spill]]  ;;  %s953_s4 = smov 64   ;;  %vm230_vm5 = vcmask 130048  }
  0x1a   :  { %154 = vmatpush.bf16.msra.mxu0 %v847_v6  ;;  %v881_v31 = vld [vmem:[%s1262_s7] ss:$0 sm:$0xff]  ;;  %s1295_s30 = sld [smem:[#allocation7_spill]]  ;;  %s954_s0 = smov 80   ;;  %v956_v49 = vmov -1e+09  }
  0x1b   :  { %s955_s7 = smov 112   ;;  %s1296_s24 = sld [smem:[#allocation6_spill]] }
  0x1c   :  { %s1297_s26 = sld [smem:[#allocation8_spill]]  ;;  %s957_s2 = smov 48  }
  0x1d   :  { %s958_s28 = smov 16  }
  0x1e   :  { %155 = vmatpush.bf16.msra.mxu0 %v846_v8  ;;  %v849_v21 = vld [vmem:[%s1293_s23 + $0x8] sm:$0xff]  ;;  %v848_v22 = vld [vmem:[%s1293_s23] sm:$0xff] }
  0x1f   :  { %218 = vmatpush.bf16.msra.mxu1 %v849_v21  ;;  %v103_v24 = vld [vmem:[%s1294_s6] sm:$0xff]  ;;  %v104_v25 = vld [vmem:[%s1294_s6 + $0x8] sm:$0xff] }
  0x20   :  { %v167_v36 = vld [vmem:[%s1295_s30] sm:$0xff]  ;;  %v168_v38 = vld [vmem:[%s1295_s30 + $0x8] sm:$0xff] }
  0x21   :  { %174 = vperm.xlu2 %875, %v168_v38   ;;  %v166_v44 = vld [vmem:[%s1296_s24] sm:$0x1] }
  0x22   :  { %156 = vmatpush.bf16.msra.mxu0 %v845_v9  ;;  %vm179_vm6 = vcmp.gt.s32.totalorder %v166_v44, 0  ;;  %v882_v46 = vld [vmem:[%s1297_s26] ss:$0 sm:$0xff] }
  0x23   :  { %219 = vmatpush.bf16.msra.mxu1 %v848_v22  ;;  %v180_v45 = vsel %vm179_vm6, 1, %v950_v2 }
  0x24   :  { %v181_v47 = vperm.slane %v180_v45, 0 }
  0x26   :  { %157 = vmatpush.bf16.msra.mxu0 %v844_v10  ;;  %vm182_vm7 = vcmp.eq.s32.totalorder %v181_v47, 1 }
  0x2a   :  { %158 = vmatpush.bf16.msra.mxu0 %v843_v11 }
  0x2e   :  { %159 = vmatpush.bf16.msra.mxu0 %v842_v12 }
  0x7b   :  { %v175_v48 = vpop.permute.xlu2 %174 }
  0x7c   :  { %vm178_vm10 = vcmp.eq.s32.totalorder %v175_v48, %v882_v46 }
  0x7d   :  { %vm184_vm11 = vmand %vm178_vm10, %vm182_vm7 }
  0x7e   :  { %v186_v55 = vsel %vm184_vm11, 0.0, %v956_v49  ;;  %vm654_vm11 = vcmask 1040384  }
  0x82   :  { %v79_v14 = vpop.permute.xlu0 %78 }
  0x83   :  { %vm83_vm1 = vcmp.eq.s32.totalorder %v79_v14, %v76_v15 }
  0x84   :  { %v749_v18 = vsel %vm83_vm1, 1.0, %v951_v17 }
  0x8a   :  { %v82_v16 = vpop.permute.xlu0 %81 }
  0x8b   :  { %vm84_vm2 = vcmp.eq.s32.totalorder %v82_v16, %v76_v15 }
  0x8c   :  { %v750_v19 = vsel %vm84_vm2, 1.0, %v951_v17 }
  0x8d   :  { %v89_v20 = vpack.c.bf16 %v750_v19, %v749_v18 }
  0x8f   :  { %775 = vmatmul.msk.bf16.vlgmr.msra.gmra.mxu0 %vm144_vm3, %v89_v20  ;;  %vm575_vm3 = vcmask 523264  }
 0x10c   :  { %v161_v23 = vpop.f32.mrf.mxu0 }
 0x10d   :  { %v1118_v27 = vadd.f32 %v161_v23, %v103_v24 }
 0x114   :  { %v163_v26 = vpop.f32.mrf.mxu0 }
 0x115   :  { %v1120_v28 = vadd.f32 %v163_v26, %v104_v25 }
 0x117   :  { %v187_v29 = vpack.c.bf16 %v1120_v28, %v1118_v27 }
 0x119   :  { %784 = vmatmul.msk.bf16.vlgmr.msra.gmra.mxu1 %vm208_vm4, %v187_v29 }
 0x196   :  { %v221_v30 = vpop.f32.mrf.mxu1 }
 0x197   :  { %v222_v33 = vadd.f32 %v881_v31, %v221_v30 }
 0x19e   :  { %v223_v32 = vpop.f32.mrf.mxu1 }
 0x19f   :  { %v224_v34 = vadd.f32 %v881_v31, %v223_v32  ;;  %v851_v32 = vld [vmem:[%s1263_s8 + $0x8] sm:$0xff] }
 0x1a1   :  { %v1128_v35 = vpack.c.bf16 %v224_v34, %v222_v33 }
 0x1a3   :  { %228 = vrot.lane.b32.xlu1 %v1128_v35, %s952_s3 }
 0x1ab   :  { %171 = vperm.xlu1 %874, %v167_v36  }
 0x1b3   :  { %274 = vrot.lane.b32.xlu1 %v1128_v35, %s953_s4 }
 0x1bb   :  { %300 = vrot.lane.b32.xlu1 %v1128_v35, %s954_s0 }
 0x1c3   :  { %298 = vrot.lane.b32.xlu1 %v1128_v35, %s955_s7  ;;  %s1298_s7 = sld [smem:[#allocation12_spill]] }
 0x215   :  { %v229_v37 = vpop.permute.xlu1 %228 }
 0x216   :  { %v235_v39 = vsel %vm230_vm5, %v229_v37, 0 }
 0x217   :  { %244 = vmatpush.bf16.xpose.msra.mxu2 %v235_v39 }
 0x21d   :  { %v172_v40 = vpop.permute.xlu1 %171 }
 0x21e   :  { %785 = vmatmul.msk.bf16.vlgmr.msra.gmra.mxu2 %vm230_vm5, %v1128_v35  ;;  %vm177_vm8 = vcmp.eq.s32.totalorder %v172_v40, %v882_v46 }
 0x21f   :  { %vm183_vm9 = vmand %vm177_vm8, %vm182_vm7  ;;  %409 = vmatpush.bf16.msrb.mxu2 %v851_v32 }
 0x220   :  { %v185_v50 = vsel %vm183_vm9, 0.0, %v956_v49 }
 0x225   :  { %v275_v41 = vpop.permute.xlu1 %274 }
 0x226   :  { %287 = vmatpush.bf16.msra.mxu3 %v275_v41 }
 0x22d   :  { %v301_v42 = vpop.permute.xlu1 %300 }
 0x22e   :  { %v306_v43 = vsel %vm230_vm5, %v301_v42, 0  ;;  %v850_v42 = vld [vmem:[%s1263_s8] sm:$0xff] }
 0x22f   :  { %315 = vmatpush.bf16.xpose.msrb.mxu3 %v306_v43  ;;  %410 = vmatpush.bf16.msrb.mxu2 %v850_v42 }
 0x235   :  { %v299_v5 = vpop.permute.xlu1 %298 }
 0x2a1   :  { %v246_v51 = vpop.f32.mrf.mxu2 }
 0x2a2   :  { %v251_v52 = vmul.f32 0.25, %v246_v51 }
 0x2a4   :  { %v253_v53 = vadd.f32 %v251_v52, %v185_v50 }
 0x2a6   :  { %v255_v54 = vsel %vm230_vm5, %v253_v53, -inf }
 0x2a7   :  { %256 = vmax.xlane.f32.xlu2 %v255_v54 }
 0x2a9   :  { %v248_v56 = vpop.f32.mrf.mxu2 }
 0x2aa   :  { %v252_v57 = vmul.f32 0.25, %v248_v56 }
 0x2ac   :  { %v254_v58 = vadd.f32 %v252_v57, %v186_v55 }
 0x2ae   :  { %v258_v59 = vsel %vm230_vm5, %v254_v58, -inf }
 0x2af   :  { %259 = vmax.xlane.f32.xlu0 %v258_v59 }
 0x31a   :  { %v257_v60 = vpop.xlane.xlu2 %256 }
 0x31b   :  { %v261_v61 = vsub.f32 %v253_v53, %v257_v60 }
 0x31d   :  { %v263_v62 = vmul.f32 1.442695, %v261_v61 }
 0x31f   :  { %892 = vpow2.f32 %v263_v62 }
 0x322   :  { %v260_v63 = vpop.xlane.xlu0 %259 }
 0x323   :  { %v262_v0 = vsub.f32 %v254_v58, %v260_v63 }
 0x325   :  { %v265_v1 = vmul.f32 1.442695, %v262_v0  ;;  %v893_v2 = vpop.eup %892  ;;  %v959_v0 = vmov 32.0  }
 0x326   :  { %v267_v31 = vsel %vm230_vm5, %v893_v2, 0.0 }
 0x327   :  { %894 = vpow2.f32 %v265_v1 }
 0x32d   :  { %v895_v3 = vpop.eup %894 }
 0x32e   :  { %v273_v4 = vpack.c.bf16 %v895_v3, %v893_v2  ;;  %v270_v16 = vsel %vm230_vm5, %v895_v3, 0.0 }
 0x330   :  { %786 = vmatmul.msk.bf16.vlgmr.msra.gmra.mxu3 %vm230_vm5, %v273_v4 }
 0x340   :  { %787 = vmatmul.msk.bf16.vlgmr.msrb.gmra.mxu3 %vm230_vm5, %v299_v5 }
 0x3b3   :  { %v289_v6 = vpop.f32.mrf.mxu3 }
 0x3bb   :  { %v291_v7 = vpop.f32.mrf.mxu3 }
 0x3c3   :  { %v317_v8 = vpop.f32.mrf.mxu3 }
 0x3c4   :  { %v322_v9 = vmul.f32 0.25, %v317_v8 }
 0x3c6   :  { %v324_v10 = vadd.f32 %v322_v9, %v185_v50 }
 0x3c8   :  { %v326_v11 = vsel %vm230_vm5, %v324_v10, -inf }
 0x3c9   :  { %327 = vmax.xlane.f32.xlu1 %v326_v11 }
 0x3cb   :  { %v319_v12 = vpop.f32.mrf.mxu3 }
 0x3cc   :  { %v323_v13 = vmul.f32 0.25, %v319_v12 }
 0x3ce   :  { %v325_v14 = vadd.f32 %v323_v13, %v186_v55  ;;  %v883_v55 = vld [vmem:[%s1264_s9] ss:$0 sm:$0xff] }
 0x3d0   :  { %v329_v15 = vsel %vm230_vm5, %v325_v14, -inf }
 0x3d1   :  { %330 = vmax.xlane.f32.xlu2 %v329_v15  ;;  %v853_v15 = vld [vmem:[%s1267_s12 + $0x8] sm:$0xff] }
 0x3d2   :  { %512 = vmatpush.bf16.msra.mxu3 %v853_v15 }
 0x3e9   :  { %345 = vrot.lane.b32.xlu2 %v1128_v35, %s957_s2 }
 0x412   :  { %271 = vadd.xlane.f32.xlu2 %v270_v16 }
 0x43c   :  { %v328_v17 = vpop.xlane.xlu1 %327 }
 0x43d   :  { %v332_v18 = vsub.f32 %v324_v10, %v328_v17 }
 0x43f   :  { %v334_v19 = vmul.f32 1.442695, %v332_v18  ;;  %v852_v18 = vld [vmem:[%s1267_s12] sm:$0xff] }
 0x440   :  { %513 = vmatpush.bf16.msra.mxu3 %v852_v18 }
 0x441   :  { %896 = vpow2.f32 %v334_v19 }
 0x444   :  { %v331_v20 = vpop.xlane.xlu2 %330 }
 0x445   :  { %v333_v21 = vsub.f32 %v325_v14, %v331_v20 }
 0x447   :  { %v897_v22 = vpop.eup %896  ;;  %v336_v23 = vmul.f32 1.442695, %v333_v21 }
 0x448   :  { %v338_v24 = vsel %vm230_vm5, %v897_v22, 0.0 }
 0x449   :  { %898 = vpow2.f32 %v336_v23  ;;  %339 = vadd.xlane.f32.xlu0 %v338_v24 }
 0x44c   :  { %v346_v25 = vpop.permute.xlu2 %345 }
 0x44d   :  { %358 = vmatpush.bf16.msrb.mxu1 %v346_v25 }
 0x44f   :  { %v899_v26 = vpop.eup %898 }
 0x450   :  { %v341_v29 = vsel %vm230_vm5, %v899_v26, 0.0  ;;  %v344_v30 = vpack.c.bf16 %v899_v26, %v897_v22 }
 0x451   :  { %342 = vadd.xlane.f32.xlu0 %v341_v29 }
 0x452   :  { %788 = vmatmul.msk.bf16.vlgmr.msrb.gmra.mxu1 %vm230_vm5, %v344_v30 }
 0x459   :  { %268 = vadd.xlane.f32.xlu0 %v267_v31 }
 0x485   :  { %v272_v43 = vpop.xlane.xlu2 %271 }
 0x4bc   :  { %v340_v33 = vpop.xlane.xlu0 %339 }
 0x4bd   :  { %900 = vrcp.f32 %v340_v33 }
 0x4c3   :  { %v901_v36 = vpop.eup %900 }
 0x4c4   :  { %v343_v34 = vpop.xlane.xlu0 %342 }
 0x4c5   :  { %902 = vrcp.f32 %v343_v34 }
 0x4c6   :  { %904 = vrcp.f32 %v272_v43 }
 0x4cb   :  { %v903_v37 = vpop.eup %902 }
 0x4cc   :  { %v269_v44 = vpop.xlane.xlu0 %268  ;;  %v905_v45 = vpop.eup %904 }
 0x4cd   :  { %906 = vrcp.f32 %v269_v44  ;;  %v297_v48 = vmul.f32 %v905_v45, %v291_v7 }
 0x4ce   :  { %908 = vrcp.f32 %v959_v0 }
 0x4cf   :  { %v360_v35 = vpop.f32.mrf.mxu1 }
 0x4d0   :  { %v367_v39 = vmul.f32 %v901_v36, %v360_v35 }
 0x4d3   :  { %v907_v46 = vpop.eup %906 }
 0x4d4   :  { %v296_v49 = vmul.f32 %v907_v46, %v289_v6  ;;  %v909_v1 = vpop.eup %908 }
 0x4d5   :  { %v428_v2 = vmul.f32 32.0, %v909_v1  ;;  %vm432_vm12 = vweird.f32 %v909_v1 }
 0x4d7   :  { %v362_v38 = vpop.f32.mrf.mxu1  ;;  %v429_v3 = vsub.f32 1.0, %v428_v2 }
 0x4d8   :  { %v368_v40 = vmul.f32 %v903_v37, %v362_v38  ;;  %v884_v37 = vld [vmem:[%s1265_s10] ss:$0 sm:$0xff]  ;;  %s960_s10 = smov [#allocation2]  }
 0x4d9   :  { %v430_v4 = vmul.f32 %v909_v1, %v429_v3  ;;  %s738_s25 = sshll.u32 %s960_s10, 4  ;;  %s739_s25 = int_to_ptr.vmem [resolvable:$true] %s738_s25 }
 0x4da   :  { %v876_v41 = vpack.i.bf16 %v368_v40, %v367_v39 }
 0x4db   :  { %v431_v5 = vadd.f32 %v909_v1, %v430_v4 }
 0x4dc   :  { %877 = vrot.lane.b32.xlu0 %v876_v41, %s958_s28  ;;  %v885_v41 = vld [vmem:[%s1266_s11] ss:$0 sm:$0xff]  ;;  %s740_s11 = sshll.u32 %s1277_s22, 4  ;;  %s741_s11 = int_to_ptr.hbm [resolvable:$true] %s740_s11 }
 0x4dd   :  { %v1179_v6 = vsel %vm432_vm12, %v909_v1, %v431_v5  ;;  %vm731_vm12 = vcmask 9216  }
 0x54e   :  { %v878_v47 = vpop.permute.xlu0 %877 }
 0x54f   :  { %v880_v50 = vunpack.i.h.bf16 %v878_v47  ;;  %v879_v51 = vunpack.i.l.bf16 %v878_v47 }
 0x551   :  { %v377_v52 = vsel %vm230_vm5, %v296_v49, %v879_v51  ;;  %v378_v53 = vsel %vm230_vm5, %v297_v48, %v880_v50  ;;  %v857_v48 = vld [vmem:[%s1269_s14 + $0x18] sm:$0xff]  ;;  %v856_v49 = vld [vmem:[%s1269_s14 + $0x10] sm:$0xff]  ;;  %v855_v50 = vld [vmem:[%s1269_s14 + $0x8] sm:$0xff] }
 0x552   :  { %v379_v54 = vpack.c.bf16 %v378_v53, %v377_v52  ;;  %583 = vmatpush.bf16.msra.mxu1 %v857_v48  ;;  %v886_v51 = vld [vmem:[%s1268_s13] ss:$0 sm:$0xff] }
 0x553   :  { %v854_v52 = vld [vmem:[%s1269_s14] sm:$0xff] }
 0x554   :  { %797 = vmatmul.msk.bf16.vlgmr.msrb.gmra.mxu2 %vm208_vm4, %v379_v54 }
 0x556   :  { %584 = vmatpush.bf16.msra.mxu1 %v856_v49 }
 0x55a   :  { %585 = vmatpush.bf16.msra.mxu1 %v855_v50  ;;  %v888_v50 = vld [vmem:[%s1271_s16] ss:$0 sm:$0xff] }
 0x55e   :  { %586 = vmatpush.bf16.msra.mxu1 %v854_v52 }
 0x5d7   :  { %v412_v56 = vpop.f32.mrf.mxu2 }
 0x5d8   :  { %v413_v57 = vadd.f32 %v883_v55, %v412_v56 }
 0x5da   :  { %v417_v58 = vadd.f32 %v413_v57, %v1118_v27 }
 0x5dc   :  { %v421_v59 = vsel %vm208_vm4, %v417_v58, 0.0 }
 0x5dd   :  { %422 = vadd.xlane.f32.xlu1 %v421_v59 }
 0x5df   :  { %v414_v60 = vpop.f32.mrf.mxu2 }
 0x5e0   :  { %v415_v61 = vadd.f32 %v883_v55, %v414_v60 }
 0x5e2   :  { %v418_v62 = vadd.f32 %v415_v61, %v1120_v28 }
 0x5e4   :  { %v424_v63 = vsel %vm208_vm4, %v418_v62, 0.0 }
 0x5e5   :  { %425 = vadd.xlane.f32.xlu1 %v424_v63 }
 0x650   :  { %v423_v27 = vpop.xlane.xlu1 %422 }
 0x651   :  { %v434_v7 = vmul.f32 %v1179_v6, %v423_v27 }
 0x653   :  { %v436_v8 = vsub.f32 %v417_v58, %v434_v7 }
 0x655   :  { %v438_v9 = vmul.f32 %v436_v8, %v436_v8 }
 0x657   :  { %v440_v28 = vsel %vm208_vm4, %v438_v9, 0.0 }
 0x658   :  { %441 = vadd.xlane.f32.xlu1 %v440_v28  ;;  %v426_v10 = vpop.xlane.xlu1 %425 }
 0x659   :  { %v435_v11 = vmul.f32 %v1179_v6, %v426_v10 }
 0x65b   :  { %v437_v12 = vsub.f32 %v418_v62, %v435_v11 }
 0x65d   :  { %v439_v13 = vmul.f32 %v437_v12, %v437_v12 }
 0x65f   :  { %v443_v14 = vsel %vm208_vm4, %v439_v13, 0.0 }
 0x660   :  { %444 = vadd.xlane.f32.xlu0 %v443_v14 }
 0x6cb   :  { %v442_v16 = vpop.xlane.xlu1 %441 }
 0x6cc   :  { %v446_v17 = vmul.f32 %v442_v16, %v1179_v6 }
 0x6ce   :  { %v448_v19 = vadd.f32 1e-12, %v446_v17 }
 0x6d0   :  { %910 = vrsqrt.f32 %v448_v19  ;;  %vm456_vm14 = vweird.f32 %v448_v19 }
 0x6d3   :  { %v445_v20 = vpop.xlane.xlu0 %444 }
 0x6d4   :  { %v447_v21 = vmul.f32 %v445_v20, %v1179_v6 }
 0x6d6   :  { %v911_v22 = vpop.eup %910  ;;  %v449_v23 = vadd.f32 1e-12, %v447_v21 }
 0x6d7   :  { %v451_v24 = vmul.f32 %v911_v22, %v448_v19  ;;  %vm457_vm13 = vweird.f32 %v911_v22 }
 0x6d8   :  { %912 = vrsqrt.f32 %v449_v23  ;;  %vm458_vm15 = vmor %vm456_vm14, %vm457_vm13  ;;  %vm466_vm1 = vweird.f32 %v449_v23 }
 0x6d9   :  { %v452_v25 = vmul.f32 %v911_v22, %v451_v24 }
 0x6db   :  { %v453_v26 = vmul.f32 0.5, %v452_v25 }
 0x6dd   :  { %v454_v29 = vsub.f32 1.5, %v453_v26 }
 0x6de   :  { %v913_v30 = vpop.eup %912 }
 0x6df   :  { %v455_v31 = vmul.f32 %v911_v22, %v454_v29  ;;  %v461_v32 = vmul.f32 %v913_v30, %v449_v23  ;;  %vm467_vm0 = vweird.f32 %v913_v30 }
 0x6e0   :  { %vm468_vm2 = vmor %vm466_vm1, %vm467_vm0 }
 0x6e1   :  { %v462_v33 = vmul.f32 %v913_v30, %v461_v32  ;;  %v459_v34 = vsel %vm458_vm15, %v911_v22, %v455_v31  ;;  %v859_v32 = vld [vmem:[%s1273_s18 + $0x8] sm:$0xff] }
 0x6e2   :  { %v470_v38 = vmul.f32 %v459_v34, %v436_v8  ;;  %686 = vmatpush.bf16.msra.mxu2 %v859_v32 }
 0x6e3   :  { %v463_v35 = vmul.f32 0.5, %v462_v33 }
 0x6e4   :  { %v475_v42 = vmul.f32 %v884_v37, %v470_v38 }
 0x6e5   :  { %v464_v36 = vsub.f32 1.5, %v463_v35 }
 0x6e6   :  { %v480_v45 = vadd.f32 %v885_v41, %v475_v42 }
 0x6e7   :  { %v465_v39 = vmul.f32 %v913_v30, %v464_v36  ;;  %v858_v36 = vld [vmem:[%s1273_s18] sm:$0xff] }
 0x6e8   :  { %687 = vmatpush.bf16.msra.mxu2 %v858_v36 }
 0x6e9   :  { %v469_v40 = vsel %vm468_vm2, %v913_v30, %v465_v39 }
 0x6ea   :  { %v471_v43 = vmul.f32 %v469_v40, %v437_v12  ;;  %v887_v12 = vld [vmem:[%s1270_s15] ss:$0 sm:$0xff] }
 0x6ec   :  { %v476_v44 = vmul.f32 %v884_v37, %v471_v43 }
 0x6ee   :  { %v481_v46 = vadd.f32 %v885_v41, %v476_v44 }
 0x6f0   :  { %v482_v47 = vpack.c.bf16 %v481_v46, %v480_v45 }
 0x6f2   :  { %806 = vmatmul.msk.bf16.vlgmr.msra.gmra.mxu3 %vm208_vm4, %v482_v47 }
 0x775   :  { %v515_v53 = vpop.f32.mrf.mxu3 }
 0x776   :  { %v516_v54 = vadd.f32 %v886_v51, %v515_v53  ;;  %v889_v53 = vld [vmem:[%s1298_s7] ss:$0 sm:$0xff] }
 0x778   :  { %v520_v55 = vmul.f32 %v516_v54, %v516_v54 }
 0x77a   :  { %v522_v56 = vmul.f32 %v520_v55, %v516_v54 }
 0x77c   :  { %v524_v57 = vmul.f32 0.044715, %v522_v56 }
 0x77d   :  { %v517_v58 = vpop.f32.mrf.mxu3 }
 0x77e   :  { %v526_v59 = vadd.f32 %v524_v57, %v516_v54  ;;  %v518_v60 = vadd.f32 %v886_v51, %v517_v58 }
 0x780   :  { %v528_v61 = vmul.f32 0.7978846, %v526_v59  ;;  %v521_v62 = vmul.f32 %v518_v60, %v518_v60 }
 0x782   :  { %v523_v63 = vmul.f32 %v521_v62, %v518_v60  ;;  %914 = vtanh.f32 %v528_v61 }
 0x784   :  { %v525_v0 = vmul.f32 0.044715, %v523_v63 }
 0x786   :  { %v527_v1 = vadd.f32 %v525_v0, %v518_v60  ;;  %v861_v0 = vld [vmem:[%s1275_s20 + $0x8] sm:$0xff] }
 0x787   :  { %724 = vmatpush.bf16.msrb.mxu0 %v861_v0 }
 0x788   :  { %v529_v2 = vmul.f32 0.7978846, %v527_v1  ;;  %v915_v3 = vpop.eup %914  ;;  %v860_v1 = vld [vmem:[%s1275_s20] sm:$0xff] }
 0x789   :  { %v532_v4 = vadd.f32 1.0, %v915_v3 }
 0x78a   :  { %916 = vtanh.f32 %v529_v2  ;;  %v890_v2 = vld [vmem:[%s1274_s19] ss:$0 sm:$0xff] }
 0x78b   :  { %v534_v27 = vmul.f32 0.5, %v532_v4  ;;  %725 = vmatpush.bf16.msrb.mxu0 %v860_v1 }
 0x78d   :  { %v536_v9 = vmul.f32 %v534_v27, %v516_v54 }
 0x790   :  { %v917_v5 = vpop.eup %916 }
 0x791   :  { %v533_v7 = vadd.f32 1.0, %v917_v5 }
 0x793   :  { %v535_v8 = vmul.f32 0.5, %v533_v7 }
 0x795   :  { %v537_v28 = vmul.f32 %v535_v8, %v518_v60  ;;  %v891_v8 = vld [vmem:[%s1276_s21] ss:$0 sm:$0xff] }
 0x797   :  { %v538_v10 = vpack.c.bf16 %v537_v28, %v536_v9 }
 0x799   :  { %823 = vmatmul.msk.bf16.vlgmr.msra.gmra.mxu1 %vm575_vm3, %v538_v10 }
 0x816   :  { %v588_v11 = vpop.f32.mrf.mxu1 }
 0x817   :  { %v589_v16 = vadd.f32 %v887_v12, %v588_v11 }
 0x819   :  { %v593_v18 = vadd.f32 %v589_v16, %v480_v45 }
 0x81b   :  { %v597_v19 = vsel %vm208_vm4, %v593_v18, 0.0 }
 0x81e   :  { %v590_v13 = vpop.f32.mrf.mxu1 }
 0x81f   :  { %v591_v14 = vadd.f32 %v887_v12, %v590_v13 }
 0x821   :  { %v594_v15 = vadd.f32 %v591_v14, %v481_v46 }
 0x823   :  { %v600_v17 = vsel %vm208_vm4, %v594_v15, 0.0 }
 0x824   :  { %601 = vadd.xlane.f32.xlu1 %v600_v17 }
 0x82c   :  { %598 = vadd.xlane.f32.xlu1 %v597_v19 }
 0x897   :  { %v602_v20 = vpop.xlane.xlu1 %601 }
 0x898   :  { %v604_v21 = vmul.f32 %v602_v20, %v1179_v6 }
 0x89a   :  { %v606_v22 = vsub.f32 %v594_v15, %v604_v21 }
 0x89c   :  { %v608_v23 = vmul.f32 %v606_v22, %v606_v22 }
 0x89e   :  { %v612_v24 = vsel %vm208_vm4, %v608_v23, 0.0 }
 0x89f   :  { %613 = vadd.xlane.f32.xlu1 %v612_v24  ;;  %v599_v25 = vpop.xlane.xlu1 %598 }
 0x8a0   :  { %v603_v26 = vmul.f32 %v599_v25, %v1179_v6 }
 0x8a2   :  { %v605_v29 = vsub.f32 %v593_v18, %v603_v26 }
 0x8a4   :  { %v607_v30 = vmul.f32 %v605_v29, %v605_v29 }
 0x8a6   :  { %v609_v31 = vsel %vm208_vm4, %v607_v30, 0.0 }
 0x8a7   :  { %610 = vadd.xlane.f32.xlu2 %v609_v31 }
 0x912   :  { %v614_v33 = vpop.xlane.xlu1 %613 }
 0x913   :  { %v616_v34 = vmul.f32 %v614_v33, %v1179_v6 }
 0x915   :  { %v618_v35 = vadd.f32 1e-12, %v616_v34 }
 0x917   :  { %918 = vrsqrt.f32 %v618_v35  ;;  %vm635_vm6 = vweird.f32 %v618_v35 }
 0x91a   :  { %v611_v37 = vpop.xlane.xlu2 %610 }
 0x91b   :  { %v615_v38 = vmul.f32 %v611_v37, %v1179_v6 }
 0x91d   :  { %v919_v39 = vpop.eup %918  ;;  %v617_v40 = vadd.f32 1e-12, %v615_v38 }
 0x91e   :  { %v630_v41 = vmul.f32 %v919_v39, %v618_v35  ;;  %vm636_vm5 = vweird.f32 %v919_v39 }
 0x91f   :  { %920 = vrsqrt.f32 %v617_v40  ;;  %vm637_vm7 = vmor %vm635_vm6, %vm636_vm5  ;;  %vm625_vm9 = vweird.f32 %v617_v40 }
 0x920   :  { %v631_v42 = vmul.f32 %v919_v39, %v630_v41 }
 0x922   :  { %v632_v43 = vmul.f32 0.5, %v631_v42 }
 0x924   :  { %v633_v44 = vsub.f32 1.5, %v632_v43 }
 0x925   :  { %v921_v45 = vpop.eup %920 }
 0x926   :  { %v634_v46 = vmul.f32 %v919_v39, %v633_v44  ;;  %v620_v47 = vmul.f32 %v921_v45, %v617_v40  ;;  %vm626_vm8 = vweird.f32 %v921_v45 }
 0x927   :  { %vm627_vm10 = vmor %vm625_vm9, %vm626_vm8 }
 0x928   :  { %v638_v48 = vsel %vm637_vm7, %v919_v39, %v634_v46  ;;  %v621_v49 = vmul.f32 %v921_v45, %v620_v47 }
 0x929   :  { %v640_v6 = vmul.f32 %v638_v48, %v606_v22 }
 0x92a   :  { %v622_v51 = vmul.f32 0.5, %v621_v49 }
 0x92b   :  { %v645_v54 = vmul.f32 %v888_v50, %v640_v6 }
 0x92c   :  { %v623_v52 = vsub.f32 1.5, %v622_v51 }
 0x92d   :  { %v650_v57 = vadd.f32 %v889_v53, %v645_v54 }
 0x92e   :  { %v624_v55 = vmul.f32 %v921_v45, %v623_v52 }
 0x92f   :  { %v652_v60 = vrot.slane %v650_v57, 7 }
 0x930   :  { %v628_v56 = vsel %vm627_vm10, %v921_v45, %v624_v55 }
 0x931   :  { %v639_v58 = vmul.f32 %v628_v56, %v605_v29 }
 0x933   :  { %v644_v59 = vmul.f32 %v888_v50, %v639_v58 }
 0x935   :  { %v649_v61 = vadd.f32 %v889_v53, %v644_v59 }
 0x937   :  { %v655_v62 = vsel %vm654_vm11, %v649_v61, %v652_v60 }
 0x938   :  { %v656_v63 = vpack.c.bf16 %v655_v62, %v655_v62 }
 0x93a   :  { %832 = vmatmul.msk.bf16.vlgmr.msra.gmra.mxu2 %vm208_vm4, %v656_v63 }
 0x9bd   :  { %v689_v3 = vpop.f32.mrf.mxu2 }
 0x9be   :  { %v690_v4 = vadd.f32 %v890_v2, %v689_v3 }
 0x9c0   :  { %922 = vtanh.f32 %v690_v4 }
 0x9c5   :  { %v691_v5 = vpop.f32.mrf.mxu2 }
 0x9c6   :  { %v923_v27 = vpop.eup %922 }
 0x9c7   :  { %v694_v7 = vpack.c.bf16 %v923_v27, %v923_v27 }
 0x9c9   :  { %841 = vmatmul.msk.bf16.vlgmr.msrb.gmra.mxu0 %vm208_vm4, %v694_v7 }
 0xa46   :  { %v727_v9 = vpop.f32.mrf.mxu0 }
 0xa47   :  { %v728_v28 = vadd.f32 %v891_v8, %v727_v9 }
 0xa49   :  { %732 = vst.msk [vmem:[#allocation2] sm:$0x3] %vm731_vm12, %v728_v28 }
 0xa4a   :  { %743 = dma.vmem_to_hbm [thread:$0]  %s739_s25, 32, %s741_s11, [#allocation3]  }
 0xa4e   :  { %v729_v10 = vpop.f32.mrf.mxu0 }
 0xa4f   :  { %948 = dma.done.wait [#allocation3], 32  }
 0xa50   :  { %949 = vsyncadd [#allocation3], 4294967264 }
 0xa51   :  { %748 = vsyncpa [#allocation3], 1 }

</bundles_post_ra>
